<compile_context>
chip_gen: v7x
topology: tpu7x:2x2x1
jax: 0.10.0
libtpu: 0.0.40
codegen_flags: <defaults>
</compile_context>

<pallas_src>
import functools
import math

import jax
import jax.numpy as jnp
from jax.experimental import pallas as pl
from jax.experimental.pallas import tpu as pltpu


_VMEM_LIMIT_BYTES = 48 * 1024 * 1024


def _proj_kernel(feat_ref, w_ref, b_ref, tbl_ref, q_ref, k_ref, v_ref, kp_ref):
    """Per-row-tile qkv projection + key/table projections.

    feat_ref: (T, D) f32     (row tile)
    w_ref   : (D, 3D) f32    (full, DMA'd once)
    b_ref   : (1, 3D) f32
    tbl_ref : (3*Q, D) f32   rows = [table_x[1]; table_y[1]; table_z[1]]
    outputs : q/k/v (T, D) bf16, kp = k @ tbl^T  (T, 3*Q) f32
    """
    feat = feat_ref[...]
    d = feat.shape[1]
    qkv = jnp.dot(feat, w_ref[...], preferred_element_type=jnp.float32) + b_ref[...]
    q = qkv[:, 0:d]
    k = qkv[:, d:2 * d]
    v = qkv[:, 2 * d:3 * d]
    q_ref[...] = q.astype(q_ref.dtype)
    k_ref[...] = k.astype(k_ref.dtype)
    v_ref[...] = v.astype(v_ref.dtype)
    kp_ref[...] = jax.lax.dot_general(
        k, tbl_ref[...], (((1,), (1,)), ((), ())),
        preferred_element_type=jnp.float32)


def _attn_kernel(*refs, dims, use_bias, quant_length, voxel_size, quant_size,
                 clamp_max):
    if use_bias:
        q_ref, k_ref, v_ref, kp_ref, vd_ref, o_ref = refs
    else:
        q_ref, k_ref, v_ref, o_ref = refs

    # (T, N) logits: q_tile @ K^T  — bf16 operands, f32 accumulation on the MXU.
    logits = jax.lax.dot_general(
        q_ref[...], k_ref[...], (((1,), (1,)), ((), ())),
        preferred_element_type=jnp.float32)

    if use_bias:
        kp = kp_ref[...]                                   # (T, 3*Q) f32
        bias = jnp.zeros_like(logits)                      # (T, N) f32
        for a in range(3):                                 # x, y, z axes
            vd = vd_ref[a]                                 # (T, N) f32
            idx = jnp.floor((vd + voxel_size) / quant_size)
            idx = jnp.minimum(idx, clamp_max)              # torch .clamp(max=...).int()
            base = a * quant_length
            # Q-way select == per-row gather from the tiny kp projection.
            for qi in range(quant_length):
                col = kp[:, base + qi:base + qi + 1]       # (T, 1)
                bias = bias + jnp.where(idx == float(qi), col, 0.0)
        logits = logits + bias

    logits = logits * (1.0 / math.sqrt(dims))

    m = jnp.max(logits, axis=-1, keepdims=True)
    e = jnp.exp(logits - m)
    denom = jnp.sum(e, axis=-1, keepdims=True)
    attn = e * pl.reciprocal(denom, approx=True)           # EUP slot, ~free

    out = jnp.dot(attn.astype(v_ref.dtype), v_ref[...],
                  preferred_element_type=jnp.float32)
    o_ref[...] = out.astype(o_ref.dtype)


def scalar_attention(features, voxel_distances, params, *, voxel_size, quant_size,
                     position_encode_type="Contextual-based", row_tile=128):
    """Forward pass matching Scalar_Attention.forward."""
    n, d = features.shape
    contextual = position_encode_type == "Contextual-based"

    quant_length = int((2 * voxel_size + 0.0001) // quant_size) if contextual else 1
    # Matches torch: clamp(max=2*vs/qs - 1) followed by .int() truncation.
    clamp_max = float(math.floor(voxel_size * 2.0 / quant_size - 1.0))

    # Largest row tile <= row_tile that divides N exactly (keeps blocks exact).
    tile = row_tile if (row_tile <= n and n % row_tile == 0) else n
    grid = (n // tile,)

    w = params["w_qkv"].astype(jnp.float32)                   # (D, 3D) == torch weight.T
    b = params["b_qkv"].reshape(1, -1).astype(jnp.float32)    # (1, 3D)
    if contextual:
        tbl = jnp.concatenate(
            [params["table_x"][1], params["table_y"][1], params["table_z"][1]],
            axis=0).astype(jnp.float32)                       # (3*Q, D)
    else:
        tbl = jnp.zeros((3, d), jnp.float32)                  # dummy, Q == 1

    cparams = pltpu.CompilerParams(
        dimension_semantics=("parallel",),
        vmem_limit_bytes=_VMEM_LIMIT_BYTES)

    # ---- Kernel 1: qkv projection + tiny table projections (row-tiled) -------
    q_all, k_all, v_all, kp_all = pl.pallas_call(
        _proj_kernel,
        grid_spec=pltpu.PrefetchScalarGridSpec(
            num_scalar_prefetch=0, grid=grid,
            in_specs=[
                pl.BlockSpec((tile, d), lambda i: (i, 0)),                 # features tile
                pl.BlockSpec((d, 3 * d), lambda i: (0, 0)),                # W (once)
                pl.BlockSpec((1, 3 * d), lambda i: (0, 0)),                # b (once)
                pl.BlockSpec((3 * quant_length, d), lambda i: (0, 0)),     # tables (once)
            ],
            out_specs=(
                pl.BlockSpec((tile, d), lambda i: (i, 0)),
                pl.BlockSpec((tile, d), lambda i: (i, 0)),
                pl.BlockSpec((tile, d), lambda i: (i, 0)),
                pl.BlockSpec((tile, 3 * quant_length), lambda i: (i, 0)),
            )),
        out_shape=(
            jax.ShapeDtypeStruct((n, d), jnp.bfloat16),    # q
            jax.ShapeDtypeStruct((n, d), jnp.bfloat16),    # k
            jax.ShapeDtypeStruct((n, d), jnp.bfloat16),    # v
            jax.ShapeDtypeStruct((n, 3 * quant_length), jnp.float32),  # k @ tables^T
        ),
        compiler_params=cparams,
    )(features.astype(jnp.float32), w, b, tbl)

    # ---- Kernel 2: row-tiled attention with contextual key position bias -----
    in_specs = [
        pl.BlockSpec((tile, d), lambda i: (i, 0)),   # q tile
        pl.BlockSpec((n, d), lambda i: (0, 0)),      # full K (DMA'd once)
        pl.BlockSpec((n, d), lambda i: (0, 0)),      # full V (DMA'd once)
    ]
    inputs = [q_all, k_all, v_all]
    if contextual:
        vd_t = jnp.transpose(voxel_distances, (2, 0, 1)).astype(jnp.float32)  # (3, N, N)
        in_specs += [
            pl.BlockSpec((tile, 3 * quant_length), lambda i: (i, 0)),   # kp tile
            pl.BlockSpec((3, tile, n), lambda i: (0, i, 0)),            # vd rows of tile
        ]
        inputs += [kp_all, vd_t]

    kernel = functools.partial(
        _attn_kernel, dims=d, use_bias=contextual, quant_length=quant_length,
        voxel_size=float(voxel_size), quant_size=float(quant_size),
        clamp_max=clamp_max)

    return pl.pallas_call(
        kernel,
        grid_spec=pltpu.PrefetchScalarGridSpec(
            num_scalar_prefetch=0, grid=grid,
            in_specs=in_specs,
            out_specs=pl.BlockSpec((tile, d), lambda i: (i, 0))),
        out_shape=jax.ShapeDtypeStruct((n, d), jnp.float32),
        compiler_params=cparams,
    )(*inputs)


def _reference(features, voxel_distances, params, *, voxel_size, quant_size):
    """Pure-JAX f32 reference mirroring the PyTorch forward (Contextual branch)."""
    n, d = features.shape
    qkv = features @ params["w_qkv"] + params["b_qkv"]
    q, k, v = qkv[:, :d], qkv[:, d:2 * d], qkv[:, 2 * d:]
    idx = jnp.floor((voxel_distances + voxel_size) / quant_size)
    idx = jnp.minimum(idx, voxel_size * 2.0 / quant_size - 1.0).astype(jnp.int32)
    enc_k = (params["table_x"][1][idx[:, :, 0]]
             + params["table_y"][1][idx[:, :, 1]]
             + params["table_z"][1][idx[:, :, 2]])
    bias = jnp.einsum("id,ijd->ij", k, enc_k)
    logits = (q @ k.T + bias) / math.sqrt(d)
    attn = jax.nn.softmax(logits, axis=-1)
    return attn @ v


if __name__ == "__main__":
    # Small but lane-friendly configuration (row tile = 128 -> grid of 2).
    N = 256          # points_num
    D = 32           # dims
    voxel_size = 0.5
    quant_size = 0.05
    quant_length = int((2 * voxel_size + 0.0001) // quant_size)   # 20

    key = jax.random.PRNGKey(0)
    k_feat, k_vd, k_w, k_b, k_tx, k_ty, k_tz = jax.random.split(key, 7)

    features = jax.random.normal(k_feat, (N, D), dtype=jnp.float32)
    # distances within [-voxel_size, voxel_size) so indexes are in-range
    voxel_distances = jax.random.uniform(
        k_vd, (N, N, 3), minval=-voxel_size, maxval=voxel_size - 1e-3,
        dtype=jnp.float32)

    params = {
        # nn.Linear(D, 3D): torch weight is (3D, D); we store its transpose (D, 3D).
        "w_qkv": jax.random.normal(k_w, (D, 3 * D), dtype=jnp.float32) * 0.05,
        "b_qkv": jax.random.normal(k_b, (3 * D,), dtype=jnp.float32) * 0.01,
        # tables: (3, quant_length, D), trunc_normal-like deterministic init.
        "table_x": jax.random.normal(k_tx, (3, quant_length, D), dtype=jnp.float32) * 0.02,
        "table_y": jax.random.normal(k_ty, (3, quant_length, D), dtype=jnp.float32) * 0.02,
        "table_z": jax.random.normal(k_tz, (3, quant_length, D), dtype=jnp.float32) * 0.02,
    }

    out = scalar_attention(features, voxel_distances, params,
                           voxel_size=voxel_size, quant_size=quant_size,
                           position_encode_type="Contextual-based",
                           row_tile=128)
    out = jax.block_until_ready(out)

    ref = _reference(features, voxel_distances, params,
                     voxel_size=voxel_size, quant_size=quant_size)
    assert out.shape == (N, D)
    max_err = jnp.max(jnp.abs(out - ref))
    # bf16 MXU operands + approx reciprocal => slightly looser tolerance than pure f32.
    assert jnp.allclose(out, ref, atol=2e-3, rtol=2e-2), f"mismatch vs reference: {max_err}"

    print("KERNEL_OK")
</pallas_src>

<mosaic_0001>
module attributes {stable_mosaic.version = 11 : i64} {
  func.func @_proj_kernel(%arg0: i32, %arg1: memref<128x32xf32, #tpu.memory_space<vmem>>, %arg2: memref<32x96xf32, #tpu.memory_space<vmem>>, %arg3: memref<1x96xf32, #tpu.memory_space<vmem>>, %arg4: memref<60x32xf32, #tpu.memory_space<vmem>>, %arg5: memref<128x32xbf16, #tpu.memory_space<vmem>>, %arg6: memref<128x32xbf16, #tpu.memory_space<vmem>>, %arg7: memref<128x32xbf16, #tpu.memory_space<vmem>>, %arg8: memref<128x60xf32, #tpu.memory_space<vmem>>) attributes {dimension_semantics = [#tpu.dimension_semantics<parallel>], iteration_bounds = array<i64: 2>, scalar_prefetch = 0 : i64, scratch_operands = 0 : i64, tpu.core_type = #tpu.core_type<tc>, window_params = [{transform_indices = @transform_0, window_bounds = array<i64: 128, 32>}, {pipeline_mode = #tpu.pipeline_mode<synchronous>, transform_indices = @transform_1, window_bounds = array<i64: 32, 96>}, {pipeline_mode = #tpu.pipeline_mode<synchronous>, transform_indices = @transform_2, window_bounds = array<i64: 1, 96>}, {pipeline_mode = #tpu.pipeline_mode<synchronous>, transform_indices = @transform_3, window_bounds = array<i64: 60, 32>}, {transform_indices = @transform_4, window_bounds = array<i64: 128, 32>}, {transform_indices = @transform_5, window_bounds = array<i64: 128, 32>}, {transform_indices = @transform_6, window_bounds = array<i64: 128, 32>}, {transform_indices = @transform_7, window_bounds = array<i64: 128, 60>}]} {
    %c0 = arith.constant 0 : index
    %c0_0 = arith.constant 0 : index
    %0 = vector.load %arg1[%c0, %c0_0] : memref<128x32xf32, #tpu.memory_space<vmem>>, vector<128x32xf32>
    %c0_1 = arith.constant 0 : index
    %c0_2 = arith.constant 0 : index
    %1 = vector.load %arg2[%c0_1, %c0_2] : memref<32x96xf32, #tpu.memory_space<vmem>>, vector<32x96xf32>
    %cst = arith.constant dense<0.000000e+00> : vector<128x96xf32>
    %2 = tpu.matmul %0, %1, %cst {dimension_numbers = #tpu.dot_dimension_numbers<[1], [0], [0], [1], [0, 0, 1, 1], [], []>} : vector<128x32xf32>, vector<32x96xf32>, vector<128x96xf32> -> vector<128x96xf32>
    %c0_3 = arith.constant 0 : index
    %c0_4 = arith.constant 0 : index
    %3 = vector.load %arg3[%c0_3, %c0_4] : memref<1x96xf32, #tpu.memory_space<vmem>>, vector<1x96xf32>
    %4 = vector.broadcast %3 : vector<1x96xf32> to vector<128x96xf32>
    %5 = arith.addf %2, %4 : vector<128x96xf32>
    %6 = vector.extract_strided_slice %5 {offsets = [0, 0], sizes = [128, 32], strides = [1, 1]} : vector<128x96xf32> to vector<128x32xf32>
    %7 = vector.extract_strided_slice %5 {offsets = [0, 32], sizes = [128, 32], strides = [1, 1]} : vector<128x96xf32> to vector<128x32xf32>
    %8 = vector.extract_strided_slice %5 {offsets = [0, 64], sizes = [128, 32], strides = [1, 1]} : vector<128x96xf32> to vector<128x32xf32>
    %9 = arith.truncf %6 : vector<128x32xf32> to vector<128x32xbf16>
    %c0_5 = arith.constant 0 : index
    %c0_6 = arith.constant 0 : index
    %10 = vector.load %arg5[%c0_5, %c0_6] : memref<128x32xbf16, #tpu.memory_space<vmem>>, vector<128x32xbf16>
    tpu.vector_store %arg5[%c0_5, %c0_6], %9 {strides = array<i32>} : memref<128x32xbf16, #tpu.memory_space<vmem>>, vector<128x32xbf16>,
    %11 = arith.truncf %7 : vector<128x32xf32> to vector<128x32xbf16>
    %c0_7 = arith.constant 0 : index
    %c0_8 = arith.constant 0 : index
    %12 = vector.load %arg6[%c0_7, %c0_8] : memref<128x32xbf16, #tpu.memory_space<vmem>>, vector<128x32xbf16>
    tpu.vector_store %arg6[%c0_7, %c0_8], %11 {strides = array<i32>} : memref<128x32xbf16, #tpu.memory_space<vmem>>, vector<128x32xbf16>,
    %13 = arith.truncf %8 : vector<128x32xf32> to vector<128x32xbf16>
    %c0_9 = arith.constant 0 : index
    %c0_10 = arith.constant 0 : index
    %14 = vector.load %arg7[%c0_9, %c0_10] : memref<128x32xbf16, #tpu.memory_space<vmem>>, vector<128x32xbf16>
    tpu.vector_store %arg7[%c0_9, %c0_10], %13 {strides = array<i32>} : memref<128x32xbf16, #tpu.memory_space<vmem>>, vector<128x32xbf16>,
    %c0_11 = arith.constant 0 : index
    %c0_12 = arith.constant 0 : index
    %15 = vector.load %arg4[%c0_11, %c0_12] : memref<60x32xf32, #tpu.memory_space<vmem>>, vector<60x32xf32>
    %cst_13 = arith.constant dense<0.000000e+00> : vector<128x60xf32>
    %16 = tpu.matmul %7, %15, %cst_13 {dimension_numbers = #tpu.dot_dimension_numbers<[1], [1], [0], [0], [0, 0, 1, 0], [], []>} : vector<128x32xf32>, vector<60x32xf32>, vector<128x60xf32> -> vector<128x60xf32>
    %c0_14 = arith.constant 0 : index
    %c0_15 = arith.constant 0 : index
    %17 = vector.load %arg8[%c0_14, %c0_15] : memref<128x60xf32, #tpu.memory_space<vmem>>, vector<128x60xf32>
    tpu.vector_store %arg8[%c0_14, %c0_15], %16 {strides = array<i32>} : memref<128x60xf32, #tpu.memory_space<vmem>>, vector<128x60xf32>,
    return
  }
  func.func @transform_0(%arg0: i32) -> (i32, i32) {
    %c0_i32 = arith.constant 0 : i32
    %c0_i32_0 = arith.constant 0 : i32
    return %arg0, %c0_i32 : i32, i32
  }
  func.func @transform_1(%arg0: i32) -> (i32, i32) {
    %c0_i32 = arith.constant 0 : i32
    %c0_i32_0 = arith.constant 0 : i32
    %c0_i32_1 = arith.constant 0 : i32
    return %c0_i32, %c0_i32_0 : i32, i32
  }
  func.func @transform_2(%arg0: i32) -> (i32, i32) {
    %c0_i32 = arith.constant 0 : i32
    %c0_i32_0 = arith.constant 0 : i32
    %c0_i32_1 = arith.constant 0 : i32
    return %c0_i32, %c0_i32_0 : i32, i32
  }
  func.func @transform_3(%arg0: i32) -> (i32, i32) {
    %c0_i32 = arith.constant 0 : i32
    %c0_i32_0 = arith.constant 0 : i32
    %c0_i32_1 = arith.constant 0 : i32
    return %c0_i32, %c0_i32_0 : i32, i32
  }
  func.func @transform_4(%arg0: i32) -> (i32, i32) {
    %c0_i32 = arith.constant 0 : i32
    %c0_i32_0 = arith.constant 0 : i32
    return %arg0, %c0_i32 : i32, i32
  }
  func.func @transform_5(%arg0: i32) -> (i32, i32) {
    %c0_i32 = arith.constant 0 : i32
    %c0_i32_0 = arith.constant 0 : i32
    return %arg0, %c0_i32 : i32, i32
  }
  func.func @transform_6(%arg0: i32) -> (i32, i32) {
    %c0_i32 = arith.constant 0 : i32
    %c0_i32_0 = arith.constant 0 : i32
    return %arg0, %c0_i32 : i32, i32
  }
  func.func @transform_7(%arg0: i32) -> (i32, i32) {
    %c0_i32 = arith.constant 0 : i32
    %c0_i32_0 = arith.constant 0 : i32
    return %arg0, %c0_i32 : i32, i32
  }
}

</mosaic_0001>

<bundles_post_ra>
// kernel: tpu_custom_call.1
= control target key start
LH: loop header
LB: loop body
LE: loop exit
PB: predicated region body
PF: predicated region fallthrough
CT: control target
= control target key end

     0   :  { %s1490_s24 = smov 0   ;;  %s1887_s0 = inlined_call_operand.vmem [shape: f32[256,32], index: 0, kind: input, shape index: {}]   ;;  %s1888_s1 = inlined_call_operand.vmem [shape: f32[32,96], index: 1, kind: input, shape index: {}]   ;;  %s1889_s2 = inlined_call_operand.vmem [shape: f32[1,96], index: 2, kind: input, shape index: {}]   ;;  %s1890_s3 = inlined_call_operand.vmem [shape: f32[60,32], index: 3, kind: input, shape index: {}]   ;;  %s1891_s4 = inlined_call_operand.vmem [shape: bf16[256,32], index: 4, kind: output, shape index: {0}]   ;;  %s1892_s5 = inlined_call_operand.vmem [shape: bf16[256,32], index: 5, kind: output, shape index: {1}]   ;;  %s1893_s6 = inlined_call_operand.vmem [shape: bf16[256,32], index: 6, kind: output, shape index: {2}]   ;;  %s1894_s7 = inlined_call_operand.vmem [shape: f32[256,60], index: 7, kind: output, shape index: {3}]  }
   0x1 LB: > { %s1184_s25 = sadd.s32 4294967295, %s1446_s24   ;;  %p1188_p0 = scmp.ge.s32.totalorder %s1446_s24, 1  ;;  %s1446_s24 = sphi %s1490_s24, %s18_s24  }
   0x2   : > { %p245_p1 = scmp.lt.s32.totalorder %s1446_s24, 3 }
   0x4   : > { %p246_p2 = pnand %p1188_p0, %p245_p1 }
   0x5   : > { %v338_v0 = vld [vmem:[%s1888_s1] sm:$0xff] (!%p246_p2)  ;;  %v339_v1 = vld [vmem:[%s1888_s1 + $0x8] sm:$0xff] (!%p246_p2)  ;;  %v340_v2 = vld [vmem:[%s1888_s1 + $0x10] sm:$0xff] (!%p246_p2)  ;;  %s1189_s9 = sshll.u32 (!%p246_p2), %s1184_s25, 4  ;;  %vm349_vm0 = vcmask (!%p246_p2), 261120   ;;  %vm607_vm2 = vcmask (!%p246_p2), 257024  }
   0x6   : > { %249 = sbr.rel (%p246_p2) target bundleno = 605 (0x25d), region = 36  ;;  %v1390_v3 = vpack.c.bf16 (!%p246_p2), %v339_v1, %v338_v0  ;;  %v341_v4 = vld [vmem:[%s1888_s1 + $0x18] sm:$0xff] (!%p246_p2)  ;;  %p293_p3 = scmp.lt.s32.totalorder (!%p246_p2), %s1189_s9, 31  ;;  %v752_v22 = vld [vmem:[%s1890_s3] sm:$0xff] (!%p246_p2)  ;;  %v753_v23 = vld [vmem:[%s1890_s3 + $0x8] sm:$0xff] (!%p246_p2)  ;;  %vm1009_vm3 = vcmask (!%p246_p2), 490496  }
   0x7   : > { %v1394_v5 = vpack.c.bf16 (!%p246_p2), %v341_v4, %v340_v2  ;;  %vm1560_vm1 = vmpackc.low (!%p246_p2), %vm349_vm0, %vm349_vm0  ;;  %v1398_v25 = vpack.c.bf16 (!%p246_p2), %v753_v23, %v752_v22  ;;  %v754_v26 = vld [vmem:[%s1890_s3 + $0x10] sm:$0xff] (!%p246_p2)  ;;  %v755_v27 = vld [vmem:[%s1890_s3 + $0x18] sm:$0xff] (!%p246_p2)  ;;  %s1448_s18 = smov (!%p246_p2), 96   ;;  %s1449_s19 = smov (!%p246_p2), 64  }
   0x8   : > { %1391 = vmatprep.subr.bf16.mxu0 (!%p246_p2), %v1390_v3  ;;  %v1404_v28 = vpack.c.bf16 (!%p246_p2), %v755_v27, %v754_v26  ;;  %v756_v29 = vld [vmem:[%s1890_s3 + $0x20] sm:$0xff] (!%p246_p2)  ;;  %v757_v30 = vld [vmem:[%s1890_s3 + $0x28] sm:$0xff] (!%p246_p2)  ;;  %v758_v32 = vld [vmem:[%s1890_s3 + $0x30] sm:$0xff] (!%p246_p2) }
   0x9   : > { %1393 = vmatpush3.bf16.msra.mxu0 (!%p246_p2), %v1390_v3  ;;  %1422 = vmatprep.subr.msk.bf16.mxu1 (!%p246_p2), %vm1560_vm1, %v1398_v25  ;;  %v1410_v31 = vpack.c.bf16 (!%p246_p2), %v757_v30, %v756_v29  ;;  %v759_v33 = vld [vmem:[%s1890_s3 + $0x38] sm:$0xf] (!%p246_p2)  ;;  %v1613_v35 = vld [vmem:[%s1889_s2] ss:$0 sm:$0xff] (!%p246_p2) }
   0xa   : > { %1395 = vmatprep.subr.bf16.mxu0 (!%p246_p2), %v1394_v5  ;;  %1426 = vmatpush3.bf16.xpose.msk.msra.mxu1 (!%p246_p2), %vm1560_vm1, %v1398_v25  ;;  %v1416_v34 = vpack.c.bf16 (!%p246_p2), %v759_v33, %v758_v32 }
   0xb   : > { %1423 = vmatprep.subr.msk.bf16.mxu1 (!%p246_p2), %vm1560_vm1, %v1404_v28 }
   0xd   : > { %s1898_s9 = smov (!%p293_p3, %s1189_s9), 31  ;;  %1397 = vmatpush3.bf16.msra.mxu0 %v1394_v5 }
   0xe   : > { %s1190_s12 = sshll.u32 %s1898_s9, 3  ;;  %1400 = vmatprep.subr.msk.bf16.mxu0 %vm1560_vm1, %v1398_v25  ;;  %s1616_s14 = sshll.u32 %s1898_s9, 2 }
   0xf   : > { %s1518_s15 = scalar_lea.vmem %s1887_s0, %s1190_s12  ;;  %s1627_s17 = scalar_lea.vmem %s1891_s4, %s1616_s14 }
  0x10   : > { %v322_v6 = vld [vmem:[%s1518_s15] sm:$0xff]  ;;  %v323_v7 = vld [vmem:[%s1518_s15 + $0x8] sm:$0xff]  ;;  %v324_v8 = vld [vmem:[%s1518_s15 + $0x10] sm:$0xff]  ;;  %s1771_s22 = scalar_lea.vmem %s1892_s5, %s1616_s14  ;;  %s1803_s26 = scalar_lea.vmem %s1893_s6, %s1616_s14 }
  0x11   : > { %1326 = vmatprep.mubr.msk.f32.mxu0 %vm349_vm0, %v322_v6  ;;  %v325_v9 = vld [vmem:[%s1518_s15 + $0x18] sm:$0xff]  ;;  %v326_v10 = vld [vmem:[%s1518_s15 + $0x20] sm:$0xff]  ;;  %v327_v11 = vld [vmem:[%s1518_s15 + $0x28] sm:$0xff]  ;;  %s1850_s29 = scalar_lea.vmem %s1894_s7, %s1190_s12 }
  0x12   : > { %1327 = vmatmul.mubr.msk.f32.vlgmr.msra.gmra.mrb[0].mxu0 %vm349_vm0, %v323_v7  ;;  %v328_v12 = vld [vmem:[%s1518_s15 + $0x30] sm:$0xff]  ;;  %v329_v13 = vld [vmem:[%s1518_s15 + $0x38] sm:$0xff]  ;;  %v330_v14 = vld [vmem:[%s1518_s15 + $0x40] sm:$0xff]  ;;  %1427 = vmatpush3.bf16.xpose.msk.msra.mxu1 %vm1560_vm1, %v1404_v28 }
  0x13   : > { %1329 = vmatprep.mubr.msk.f32.mxu0 %vm349_vm0, %v324_v8  ;;  %v331_v15 = vld [vmem:[%s1518_s15 + $0x48] sm:$0xff]  ;;  %v332_v16 = vld [vmem:[%s1518_s15 + $0x50] sm:$0xff]  ;;  %v333_v17 = vld [vmem:[%s1518_s15 + $0x58] sm:$0xff]  ;;  %1424 = vmatprep.subr.msk.bf16.mxu1 %vm1560_vm1, %v1410_v31 }
  0x14   : > { %v334_v18 = vld [vmem:[%s1518_s15 + $0x60] sm:$0xff]  ;;  %v335_v19 = vld [vmem:[%s1518_s15 + $0x68] sm:$0xff]  ;;  %v336_v20 = vld [vmem:[%s1518_s15 + $0x70] sm:$0xff] }
  0x15   : > { %v337_v21 = vld [vmem:[%s1518_s15 + $0x78] sm:$0xff] }
  0x16   : > { %1330 = vmatmul.mubr.msk.f32.gmra.mrb[2].mxu0 %vm349_vm0, %v325_v9 }
  0x17   : > { %1332 = vmatprep.mubr.msk.f32.mxu0 %vm349_vm0, %v326_v10  ;;  %1403 = vmatpush3.bf16.xpose.msk.msra.mxu0 %vm1560_vm1, %v1398_v25 }
  0x18   : > { %1406 = vmatprep.subr.msk.bf16.mxu0 %vm1560_vm1, %v1404_v28 }
  0x1a   : > { %1333 = vmatmul.mubr.msk.f32.gmra.mrb[4].mxu0 %vm349_vm0, %v327_v11  ;;  %1428 = vmatpush3.bf16.xpose.msk.msra.mxu1 %vm1560_vm1, %v1410_v31 }
  0x1b   : > { %1335 = vmatprep.mubr.msk.f32.mxu0 %vm349_vm0, %v328_v12  ;;  %1425 = vmatprep.subr.msk.bf16.mxu1 %vm1560_vm1, %v1416_v34 }
  0x1e   : > { %1336 = vmatmul.mubr.msk.f32.gmra.mrb[6].mxu0 %vm349_vm0, %v329_v13 }
  0x1f   : > { %1338 = vmatprep.mubr.msk.f32.mxu0 %vm349_vm0, %v330_v14  ;;  %1409 = vmatpush3.bf16.xpose.msk.msra.mxu0 %vm1560_vm1, %v1404_v28 }
  0x20   : > { %1412 = vmatprep.subr.msk.bf16.mxu0 %vm1560_vm1, %v1410_v31 }
  0x22   : > { %1339 = vmatmul.mubr.msk.f32.gmra.mrb[8].mxu0 %vm349_vm0, %v331_v15  ;;  %1429 = vmatpush3.bf16.xpose.msk.msra.mxu1 %vm1560_vm1, %v1416_v34 }
  0x23   : > { %1341 = vmatprep.mubr.msk.f32.mxu0 %vm349_vm0, %v332_v16 }
  0x26   : > { %1342 = vmatmul.mubr.msk.f32.gmra.mrb[10].mxu0 %vm349_vm0, %v333_v17 }
  0x27   : > { %1344 = vmatprep.mubr.msk.f32.mxu0 %vm349_vm0, %v334_v18  ;;  %1415 = vmatpush3.bf16.xpose.msk.msra.mxu0 %vm1560_vm1, %v1410_v31 }
  0x28   : > { %1418 = vmatprep.subr.msk.bf16.mxu0 %vm1560_vm1, %v1416_v34 }
  0x2a   : > { %1345 = vmatmul.mubr.msk.f32.gmra.mrb[12].mxu0 %vm349_vm0, %v335_v19 }
  0x2b   : > { %1347 = vmatprep.mubr.msk.f32.mxu0 %vm349_vm0, %v336_v20 }
  0x2e   : > { %1348 = vmatmul.mubr.msk.f32.gmra.mrb[14].mxu0 %vm349_vm0, %v337_v21 }
  0x2f   : > { %1421 = vmatpush3.bf16.xpose.msk.msra.mxu0 %vm1560_vm1, %v1416_v34 }
  0xe5   : > { %v1328_v36 = vpop.f32.mrb[0].mxu0 }
  0xe6   : > { %v470_v37 = vadd.f32 %v1328_v36, %v1613_v35  ;;  %v464_v38 = vpop.f32.mrb[1].mxu0 }
  0xe7   : > { %v465_v39 = vadd.f32 %v1613_v35, %v464_v38 }
  0xe8   : > { %v1630_v40 = vpack.c.bf16 %v470_v37, %v470_v37 }
  0xe9   : > { %v1632_v41 = vpack.c.bf16 %v465_v39, %v465_v39  ;;  %v1331_v42 = vpop.f32.mrb[2].mxu0  ;;  %776 = vrot.lane.b32.xlu0 %v465_v39, %s1448_s18 }
  0xea   : > { %609 = vst.msk [vmem:[%s1627_s17 + $0x4] sm:$0xf] %vm607_vm2, %v1630_v40  ;;  %v480_v43 = vadd.f32 %v1331_v42, %v1613_v35  ;;  %v474_v44 = vpop.f32.mrb[3].mxu0 }
  0xeb   : > { %608 = vst.msk [vmem:[%s1627_s17] sm:$0xf] %vm607_vm2, %v1632_v41  ;;  %v475_v45 = vadd.f32 %v1613_v35, %v474_v44 }
  0xec   : > { %v1643_v46 = vpack.c.bf16 %v480_v43, %v480_v43 }
  0xed   : > { %v1645_v47 = vpack.c.bf16 %v475_v45, %v475_v45  ;;  %v1334_v48 = vpop.f32.mrb[4].mxu0 }
  0xee   : > { %611 = vst.msk [vmem:[%s1627_s17 + $0xc] sm:$0xf] %vm607_vm2, %v1643_v46  ;;  %v490_v49 = vadd.f32 %v1334_v48, %v1613_v35  ;;  %v484_v50 = vpop.f32.mrb[5].mxu0 }
  0xef   : > { %610 = vst.msk [vmem:[%s1627_s17 + $0x8] sm:$0xf] %vm607_vm2, %v1645_v47  ;;  %v485_v51 = vadd.f32 %v1613_v35, %v484_v50 }
  0xf0   : > { %v1655_v52 = vpack.c.bf16 %v490_v49, %v490_v49 }
  0xf1   : > { %v1657_v53 = vpack.c.bf16 %v485_v51, %v485_v51  ;;  %v1337_v54 = vpop.f32.mrb[6].mxu0 }
  0xf2   : > { %613 = vst.msk [vmem:[%s1627_s17 + $0x14] sm:$0xf] %vm607_vm2, %v1655_v52  ;;  %v500_v55 = vadd.f32 %v1337_v54, %v1613_v35  ;;  %v494_v56 = vpop.f32.mrb[7].mxu0 }
  0xf3   : > { %612 = vst.msk [vmem:[%s1627_s17 + $0x10] sm:$0xf] %vm607_vm2, %v1657_v53  ;;  %v495_v57 = vadd.f32 %v1613_v35, %v494_v56 }
  0xf4   : > { %v1667_v58 = vpack.c.bf16 %v500_v55, %v500_v55  ;;  %790 = vrot.lane.b32.xlu0 %v500_v55, %s1448_s18 }
  0xf5   : > { %v1670_v59 = vpack.c.bf16 %v495_v57, %v495_v57  ;;  %v1340_v60 = vpop.f32.mrb[8].mxu0 }
  0xf6   : > { %615 = vst.msk [vmem:[%s1627_s17 + $0x1c] sm:$0xf] %vm607_vm2, %v1667_v58  ;;  %v510_v61 = vadd.f32 %v1340_v60, %v1613_v35  ;;  %v504_v62 = vpop.f32.mrb[9].mxu0 }
  0xf7   : > { %614 = vst.msk [vmem:[%s1627_s17 + $0x18] sm:$0xf] %vm607_vm2, %v1670_v59  ;;  %v505_v63 = vadd.f32 %v1613_v35, %v504_v62 }
  0xf8   : > { %v1680_v0 = vpack.c.bf16 %v510_v61, %v510_v61  ;;  %794 = vrot.lane.b32.xlu1 %v510_v61, %s1448_s18  ;;  %788 = vrot.lane.b32.xlu0 %v495_v57, %s1448_s18 }
  0xf9   : > { %v1266_v1 = vpack.c.bf16 %v505_v63, %v505_v63  ;;  %v1343_v2 = vpop.f32.mrb[10].mxu0 }
  0xfa   : > { %617 = vst.msk [vmem:[%s1627_s17 + $0x24] sm:$0xf] %vm607_vm2, %v1680_v0  ;;  %v520_v3 = vadd.f32 %v1343_v2, %v1613_v35  ;;  %v514_v4 = vpop.f32.mrb[11].mxu0 }
  0xfb   : > { %616 = vst.msk [vmem:[%s1627_s17 + $0x20] sm:$0xf] %vm607_vm2, %v1266_v1  ;;  %v515_v5 = vadd.f32 %v1613_v35, %v514_v4 }
  0xfc   : > { %v1269_v6 = vpack.c.bf16 %v520_v3, %v520_v3  ;;  %792 = vrot.lane.b32.xlu1 %v505_v63, %s1448_s18  ;;  %778 = vrot.lane.b32.xlu0 %v470_v37, %s1448_s18 }
  0xfd   : > { %v1268_v7 = vpack.c.bf16 %v515_v5, %v515_v5  ;;  %v1346_v8 = vpop.f32.mrb[12].mxu0 }
  0xfe   : > { %619 = vst.msk [vmem:[%s1627_s17 + $0x2c] sm:$0xf] %vm607_vm2, %v1269_v6  ;;  %v530_v9 = vadd.f32 %v1346_v8, %v1613_v35  ;;  %v524_v10 = vpop.f32.mrb[13].mxu0 }
  0xff   : > { %618 = vst.msk [vmem:[%s1627_s17 + $0x28] sm:$0xf] %vm607_vm2, %v1268_v7  ;;  %v525_v11 = vadd.f32 %v1613_v35, %v524_v10 }
 0x100   : > { %798 = vrot.lane.b32.xlu1 %v520_v3, %s1448_s18  ;;  %780 = vrot.lane.b32.xlu0 %v475_v45, %s1448_s18  ;;  %v1271_v12 = vpack.c.bf16 %v530_v9, %v530_v9 }
 0x101   : > { %v1270_v13 = vpack.c.bf16 %v525_v11, %v525_v11  ;;  %v1349_v14 = vpop.f32.mrb[14].mxu0 }
 0x102   : > { %621 = vst.msk [vmem:[%s1627_s17 + $0x34] sm:$0xf] %vm607_vm2, %v1271_v12  ;;  %v540_v15 = vadd.f32 %v1349_v14, %v1613_v35  ;;  %v534_v16 = vpop.f32.mrb[15].mxu0 }
 0x103   : > { %620 = vst.msk [vmem:[%s1627_s17 + $0x30] sm:$0xf] %vm607_vm2, %v1270_v13  ;;  %v535_v17 = vadd.f32 %v1613_v35, %v534_v16 }
 0x104   : > { %796 = vrot.lane.b32.xlu1 %v515_v5, %s1448_s18  ;;  %782 = vrot.lane.b32.xlu0 %v480_v43, %s1448_s18  ;;  %v1273_v18 = vpack.c.bf16 %v540_v15, %v540_v15 }
 0x105   : > { %v1272_v19 = vpack.c.bf16 %v535_v17, %v535_v17 }
 0x106   : > { %623 = vst.msk [vmem:[%s1627_s17 + $0x3c] sm:$0xf] %vm607_vm2, %v1273_v18 }
 0x107   : > { %622 = vst.msk [vmem:[%s1627_s17 + $0x38] sm:$0xf] %vm607_vm2, %v1272_v19 }
 0x108   : > { %802 = vrot.lane.b32.xlu1 %v530_v9, %s1448_s18  ;;  %784 = vrot.lane.b32.xlu0 %v485_v51, %s1448_s18 }
 0x10c   : > { %800 = vrot.lane.b32.xlu1 %v525_v11, %s1448_s18  ;;  %786 = vrot.lane.b32.xlu0 %v490_v49, %s1448_s18 }
 0x110   : > { %804 = vrot.lane.b32.xlu1 %v535_v17, %s1448_s18  ;;  %624 = vrot.lane.b32.xlu0 %v1632_v41, %s1448_s18 }
 0x114   : > { %806 = vrot.lane.b32.xlu1 %v540_v15, %s1448_s18  ;;  %628 = vrot.lane.b32.xlu0 %v1645_v47, %s1448_s18 }
 0x118   : > { %626 = vrot.lane.b32.xlu1 %v1630_v40, %s1448_s18  ;;  %632 = vrot.lane.b32.xlu0 %v1657_v53, %s1448_s18 }
 0x11c   : > { %630 = vrot.lane.b32.xlu1 %v1643_v46, %s1448_s18  ;;  %636 = vrot.lane.b32.xlu0 %v1670_v59, %s1448_s18 }
 0x120   : > { %634 = vrot.lane.b32.xlu1 %v1655_v52, %s1448_s18  ;;  %640 = vrot.lane.b32.xlu0 %v1266_v1, %s1448_s18 }
 0x124   : > { %638 = vrot.lane.b32.xlu1 %v1667_v58, %s1448_s18  ;;  %644 = vrot.lane.b32.xlu0 %v1268_v7, %s1448_s18 }
 0x128   : > { %642 = vrot.lane.b32.xlu1 %v1680_v0, %s1448_s18  ;;  %648 = vrot.lane.b32.xlu0 %v1270_v13, %s1448_s18 }
 0x12c   : > { %646 = vrot.lane.b32.xlu1 %v1269_v6, %s1448_s18  ;;  %688 = vrot.lane.b32.xlu0 %v1632_v41, %s1449_s19 }
 0x130   : > { %650 = vrot.lane.b32.xlu1 %v1271_v12, %s1448_s18  ;;  %692 = vrot.lane.b32.xlu0 %v1645_v47, %s1449_s19 }
 0x134   : > { %690 = vrot.lane.b32.xlu1 %v1630_v40, %s1449_s19  ;;  %696 = vrot.lane.b32.xlu0 %v1657_v53, %s1449_s19 }
 0x138   : > { %694 = vrot.lane.b32.xlu1 %v1643_v46, %s1449_s19  ;;  %700 = vrot.lane.b32.xlu0 %v1670_v59, %s1449_s19 }
 0x13c   : > { %698 = vrot.lane.b32.xlu1 %v1655_v52, %s1449_s19  ;;  %704 = vrot.lane.b32.xlu0 %v1266_v1, %s1449_s19 }
 0x140   : > { %702 = vrot.lane.b32.xlu1 %v1667_v58, %s1449_s19  ;;  %708 = vrot.lane.b32.xlu0 %v1268_v7, %s1449_s19 }
 0x144   : > { %706 = vrot.lane.b32.xlu1 %v1680_v0, %s1449_s19  ;;  %712 = vrot.lane.b32.xlu0 %v1270_v13, %s1449_s19 }
 0x148   : > { %710 = vrot.lane.b32.xlu1 %v1269_v6, %s1449_s19  ;;  %652 = vrot.lane.b32.xlu0 %v1272_v19, %s1448_s18 }
 0x14c   : > { %714 = vrot.lane.b32.xlu1 %v1271_v12, %s1449_s19  ;;  %716 = vrot.lane.b32.xlu0 %v1272_v19, %s1449_s19 }
 0x150   : > { %654 = vrot.lane.b32.xlu1 %v1273_v18, %s1448_s18 }
 0x154   : > { %718 = vrot.lane.b32.xlu1 %v1273_v18, %s1449_s19 }
 0x15b   : > { %v777_v20 = vpop.permute.xlu0 %776 }
 0x15c   : > { %1366 = vmatprep.mubr.msk.f32.mxu0 %vm349_vm0, %v777_v20 }
 0x166   : > { %v791_v21 = vpop.permute.xlu0 %790 }
 0x16a   : > { %v795_v22 = vpop.permute.xlu1 %794  ;;  %v789_v23 = vpop.permute.xlu0 %788 }
 0x16b   : > { %1375 = vmatprep.mubr.msk.f32.mxu1 %vm349_vm0, %v789_v23 }
 0x16c   : > { %1376 = vmatmul.mubr.msk.f32.vlgmr.msra.gmra.mrb[0].mxu1 %vm349_vm0, %v791_v21 }
 0x16e   : > { %v793_v24 = vpop.permute.xlu1 %792  ;;  %v779_v25 = vpop.permute.xlu0 %778 }
 0x16f   : > { %1367 = vmatmul.mubr.msk.f32.vlgmr.msra.gmra.mrb[16].mxu0 %vm349_vm0, %v779_v25  ;;  %1378 = vmatprep.mubr.msk.f32.mxu1 %vm349_vm0, %v793_v24 }
 0x170   : > { %1379 = vmatmul.mubr.msk.f32.gmra.mrb[2].mxu1 %vm349_vm0, %v795_v22 }
 0x172   : > { %v799_v26 = vpop.permute.xlu1 %798  ;;  %v781_v27 = vpop.permute.xlu0 %780 }
 0x173   : > { %1369 = vmatprep.mubr.msk.f32.mxu0 %vm349_vm0, %v781_v27 }
 0x176   : > { %v797_v28 = vpop.permute.xlu1 %796  ;;  %v783_v29 = vpop.permute.xlu0 %782 }
 0x177   : > { %1370 = vmatmul.mubr.msk.f32.gmra.mrb[18].mxu0 %vm349_vm0, %v783_v29  ;;  %1381 = vmatprep.mubr.msk.f32.mxu1 %vm349_vm0, %v797_v28 }
 0x178   : > { %1382 = vmatmul.mubr.msk.f32.gmra.mrb[4].mxu1 %vm349_vm0, %v799_v26 }
 0x17a   : > { %v803_v30 = vpop.permute.xlu1 %802  ;;  %v785_v31 = vpop.permute.xlu0 %784 }
 0x17b   : > { %1372 = vmatprep.mubr.msk.f32.mxu0 %vm349_vm0, %v785_v31 }
 0x17e   : > { %v801_v32 = vpop.permute.xlu1 %800  ;;  %v787_v33 = vpop.permute.xlu0 %786 }
 0x17f   : > { %1373 = vmatmul.mubr.msk.f32.gmra.mrb[20].mxu0 %vm349_vm0, %v787_v33  ;;  %1384 = vmatprep.mubr.msk.f32.mxu1 %vm349_vm0, %v801_v32 }
 0x180   : > { %1385 = vmatmul.mubr.msk.f32.gmra.mrb[6].mxu1 %vm349_vm0, %v803_v30 }
 0x182   : > { %v805_v34 = vpop.permute.xlu1 %804  ;;  %v625_v35 = vpop.permute.xlu0 %624 }
 0x183   : > { %672 = vst.msk [vmem:[%s1771_s22] sm:$0xf] %vm607_vm2, %v625_v35  ;;  %1387 = vmatprep.mubr.msk.f32.mxu1 %vm349_vm0, %v805_v34 }
 0x186   : > { %v807_v36 = vpop.permute.xlu1 %806  ;;  %v629_v37 = vpop.permute.xlu0 %628 }
 0x187   : > { %674 = vst.msk [vmem:[%s1771_s22 + $0x8] sm:$0xf] %vm607_vm2, %v629_v37  ;;  %1388 = vmatmul.mubr.msk.f32.gmra.mrb[8].mxu1 %vm349_vm0, %v807_v36 }
 0x18a   : > { %v627_v38 = vpop.permute.xlu1 %626  ;;  %v633_v39 = vpop.permute.xlu0 %632 }
 0x18b   : > { %673 = vst.msk [vmem:[%s1771_s22 + $0x4] sm:$0xf] %vm607_vm2, %v627_v38  ;;  %676 = vst.msk [vmem:[%s1771_s22 + $0x10] sm:$0xf] %vm607_vm2, %v633_v39 }
 0x18e   : > { %v631_v40 = vpop.permute.xlu1 %630  ;;  %v637_v41 = vpop.permute.xlu0 %636 }
 0x18f   : > { %675 = vst.msk [vmem:[%s1771_s22 + $0xc] sm:$0xf] %vm607_vm2, %v631_v40  ;;  %678 = vst.msk [vmem:[%s1771_s22 + $0x18] sm:$0xf] %vm607_vm2, %v637_v41 }
 0x192   : > { %v635_v42 = vpop.permute.xlu1 %634  ;;  %v641_v43 = vpop.permute.xlu0 %640 }
 0x193   : > { %677 = vst.msk [vmem:[%s1771_s22 + $0x14] sm:$0xf] %vm607_vm2, %v635_v42  ;;  %680 = vst.msk [vmem:[%s1771_s22 + $0x20] sm:$0xf] %vm607_vm2, %v641_v43 }
 0x196   : > { %v639_v44 = vpop.permute.xlu1 %638  ;;  %v645_v45 = vpop.permute.xlu0 %644 }
 0x197   : > { %679 = vst.msk [vmem:[%s1771_s22 + $0x1c] sm:$0xf] %vm607_vm2, %v639_v44  ;;  %682 = vst.msk [vmem:[%s1771_s22 + $0x28] sm:$0xf] %vm607_vm2, %v645_v45 }
 0x19a   : > { %v643_v46 = vpop.permute.xlu1 %642  ;;  %v649_v47 = vpop.permute.xlu0 %648 }
 0x19b   : > { %681 = vst.msk [vmem:[%s1771_s22 + $0x24] sm:$0xf] %vm607_vm2, %v643_v46  ;;  %684 = vst.msk [vmem:[%s1771_s22 + $0x30] sm:$0xf] %vm607_vm2, %v649_v47 }
 0x19e   : > { %v647_v48 = vpop.permute.xlu1 %646  ;;  %v689_v49 = vpop.permute.xlu0 %688 }
 0x19f   : > { %683 = vst.msk [vmem:[%s1771_s22 + $0x2c] sm:$0xf] %vm607_vm2, %v647_v48  ;;  %736 = vst.msk [vmem:[%s1803_s26] sm:$0xf] %vm607_vm2, %v689_v49 }
 0x1a2   : > { %v651_v50 = vpop.permute.xlu1 %650  ;;  %v693_v51 = vpop.permute.xlu0 %692 }
 0x1a3   : > { %685 = vst.msk [vmem:[%s1771_s22 + $0x34] sm:$0xf] %vm607_vm2, %v651_v50  ;;  %738 = vst.msk [vmem:[%s1803_s26 + $0x8] sm:$0xf] %vm607_vm2, %v693_v51 }
 0x1a6   : > { %v691_v52 = vpop.permute.xlu1 %690  ;;  %v697_v53 = vpop.permute.xlu0 %696 }
 0x1a7   : > { %737 = vst.msk [vmem:[%s1803_s26 + $0x4] sm:$0xf] %vm607_vm2, %v691_v52  ;;  %740 = vst.msk [vmem:[%s1803_s26 + $0x10] sm:$0xf] %vm607_vm2, %v697_v53 }
 0x1aa   : > { %v695_v54 = vpop.permute.xlu1 %694  ;;  %v701_v55 = vpop.permute.xlu0 %700 }
 0x1ab   : > { %739 = vst.msk [vmem:[%s1803_s26 + $0xc] sm:$0xf] %vm607_vm2, %v695_v54  ;;  %742 = vst.msk [vmem:[%s1803_s26 + $0x18] sm:$0xf] %vm607_vm2, %v701_v55 }
 0x1ae   : > { %v699_v56 = vpop.permute.xlu1 %698  ;;  %v705_v57 = vpop.permute.xlu0 %704 }
 0x1af   : > { %741 = vst.msk [vmem:[%s1803_s26 + $0x14] sm:$0xf] %vm607_vm2, %v699_v56  ;;  %744 = vst.msk [vmem:[%s1803_s26 + $0x20] sm:$0xf] %vm607_vm2, %v705_v57 }
 0x1b2   : > { %v703_v58 = vpop.permute.xlu1 %702  ;;  %v709_v59 = vpop.permute.xlu0 %708 }
 0x1b3   : > { %743 = vst.msk [vmem:[%s1803_s26 + $0x1c] sm:$0xf] %vm607_vm2, %v703_v58  ;;  %746 = vst.msk [vmem:[%s1803_s26 + $0x28] sm:$0xf] %vm607_vm2, %v709_v59 }
 0x1b6   : > { %v707_v60 = vpop.permute.xlu1 %706  ;;  %v713_v61 = vpop.permute.xlu0 %712 }
 0x1b7   : > { %745 = vst.msk [vmem:[%s1803_s26 + $0x24] sm:$0xf] %vm607_vm2, %v707_v60  ;;  %748 = vst.msk [vmem:[%s1803_s26 + $0x30] sm:$0xf] %vm607_vm2, %v713_v61 }
 0x1ba   : > { %v711_v62 = vpop.permute.xlu1 %710  ;;  %v653_v63 = vpop.permute.xlu0 %652 }
 0x1bb   : > { %747 = vst.msk [vmem:[%s1803_s26 + $0x2c] sm:$0xf] %vm607_vm2, %v711_v62  ;;  %686 = vst.msk [vmem:[%s1771_s22 + $0x38] sm:$0xf] %vm607_vm2, %v653_v63 }
 0x1be   : > { %v715_v0 = vpop.permute.xlu1 %714  ;;  %v717_v1 = vpop.permute.xlu0 %716 }
 0x1bf   : > { %749 = vst.msk [vmem:[%s1803_s26 + $0x34] sm:$0xf] %vm607_vm2, %v715_v0  ;;  %750 = vst.msk [vmem:[%s1803_s26 + $0x38] sm:$0xf] %vm607_vm2, %v717_v1 }
 0x1c2   : > { %v655_v2 = vpop.permute.xlu1 %654 }
 0x1c3   : > { %687 = vst.msk [vmem:[%s1771_s22 + $0x3c] sm:$0xf] %vm607_vm2, %v655_v2 }
 0x1c6   : > { %v719_v3 = vpop.permute.xlu1 %718 }
 0x1c7   : > { %751 = vst.msk [vmem:[%s1803_s26 + $0x3c] sm:$0xf] %vm607_vm2, %v719_v3 }
 0x23f   : > { %v1377_v4 = vpop.f32.mrb[0].mxu1 }
 0x240   : > { %1017 = vst.msk [vmem:[%s1850_s29 + $0x38] sm:$0xff] %vm1009_vm3, %v1377_v4  ;;  %v960_v5 = vpop.f32.mrb[1].mxu1 }
 0x241   : > { %1016 = vst.msk [vmem:[%s1850_s29 + $0x30] sm:$0xff] %vm1009_vm3, %v960_v5 }
 0x242   : > { %v1368_v6 = vpop.f32.mrb[16].mxu0 }
 0x243   : > { %1011 = vst.msk [vmem:[%s1850_s29 + $0x8] sm:$0xff] %vm1009_vm3, %v1368_v6  ;;  %v930_v7 = vpop.f32.mrb[17].mxu0  ;;  %v1380_v8 = vpop.f32.mrb[2].mxu1 }
 0x244   : > { %1010 = vst.msk [vmem:[%s1850_s29] sm:$0xff] %vm1009_vm3, %v930_v7  ;;  %1019 = vst.msk [vmem:[%s1850_s29 + $0x48] sm:$0xff] %vm1009_vm3, %v1380_v8  ;;  %v970_v9 = vpop.f32.mrb[3].mxu1 }
 0x245   : > { %1018 = vst.msk [vmem:[%s1850_s29 + $0x40] sm:$0xff] %vm1009_vm3, %v970_v9 }
 0x24a   : > { %v1371_v10 = vpop.f32.mrb[18].mxu0 }
 0x24b   : > { %1013 = vst.msk [vmem:[%s1850_s29 + $0x18] sm:$0xff] %vm1009_vm3, %v1371_v10  ;;  %v940_v11 = vpop.f32.mrb[19].mxu0  ;;  %v1383_v12 = vpop.f32.mrb[4].mxu1 }
 0x24c   : > { %1012 = vst.msk [vmem:[%s1850_s29 + $0x10] sm:$0xff] %vm1009_vm3, %v940_v11  ;;  %1021 = vst.msk [vmem:[%s1850_s29 + $0x58] sm:$0xff] %vm1009_vm3, %v1383_v12  ;;  %v980_v13 = vpop.f32.mrb[5].mxu1 }
 0x24d   : > { %1020 = vst.msk [vmem:[%s1850_s29 + $0x50] sm:$0xff] %vm1009_vm3, %v980_v13 }
 0x252   : > { %v1374_v14 = vpop.f32.mrb[20].mxu0 }
 0x253   : > { %1015 = vst.msk [vmem:[%s1850_s29 + $0x28] sm:$0xff] %vm1009_vm3, %v1374_v14  ;;  %v950_v15 = vpop.f32.mrb[21].mxu0  ;;  %v1386_v16 = vpop.f32.mrb[6].mxu1 }
 0x254   : > { %1014 = vst.msk [vmem:[%s1850_s29 + $0x20] sm:$0xff] %vm1009_vm3, %v950_v15  ;;  %1023 = vst.msk [vmem:[%s1850_s29 + $0x68] sm:$0xff] %vm1009_vm3, %v1386_v16  ;;  %v990_v17 = vpop.f32.mrb[7].mxu1 }
 0x255   : > { %1022 = vst.msk [vmem:[%s1850_s29 + $0x60] sm:$0xff] %vm1009_vm3, %v990_v17 }
 0x25a   : > { %v1389_v18 = vpop.f32.mrb[8].mxu1 }
 0x25b   : > { %1025 = vst.msk [vmem:[%s1850_s29 + $0x78] sm:$0xff] %vm1009_vm3, %v1389_v18  ;;  %v1000_v19 = vpop.f32.mrb[9].mxu1 }
 0x25c   : > { %1024 = vst.msk [vmem:[%s1850_s29 + $0x70] sm:$0xff] %vm1009_vm3, %v1000_v19 }
 0x25d PF: > { %s18_s24 = sadd.s32 1, %s1446_s24  }
 0x25e   : > { %p15_p4 = scmp.ge.s32.totalorder %s18_s24, 4  }
 0x260   :  { %17 = sbr.rel (!%p15_p4) target bundleno = 1 (0x1), region = 102 }

</bundles_post_ra>
